<compile_context>
chip_gen: v7x
topology: tpu7x:2x2x1
jax: 0.10.0
libtpu: 0.0.40
codegen_flags: <defaults>
</compile_context>

<pallas_src>
import functools

import jax
import jax.numpy as jnp
from jax.experimental import pallas as pl
from jax.experimental.pallas import tpu as pltpu


def _round_up(n, m):
    return ((n + m - 1) // m) * m


def _affine_kernel(x_ref, lin_ref, bias_ref, o_ref):
    # (TB, Dp) @ (Dp, Dp) on the MXU with f32 accumulation; the bias add lands
    # in the drain epilogue where VPU slots are free.  Keep the add in f32 and
    # cast only at the final store (v5e VPU has no bf16).
    acc = jnp.dot(x_ref[...], lin_ref[...], preferred_element_type=jnp.float32)
    o_ref[...] = (acc + bias_ref[...].astype(jnp.float32)).astype(o_ref.dtype)


@functools.partial(jax.jit, static_argnames=("block_b",))
def distortion_model_affine(x, noise, linear, *, block_b=512):
    """(x + noise) @ linear, computed as x @ linear + (noise @ linear)."""
    B, D = x.shape
    assert noise.shape == (1, D)
    assert linear.shape == (D, D)
    dtype = x.dtype

    # Hoisted constant-per-call bias (1,D)@(D,D): tiny, let XLA fuse it.
    bias = jnp.dot(noise, linear, preferred_element_type=jnp.float32).astype(dtype)

    # Lane-dense padding: last dim -> multiple of 128, batch -> multiple of 8
    # (and of the batch tile if we tile over B).
    Dp = _round_up(max(D, 128), 128)
    tb = _round_up(min(block_b, max(B, 8)), 8)
    Bp = _round_up(max(B, 8), tb)
    single_tile = Bp == tb

    xp = jnp.zeros((Bp, Dp), dtype).at[:B, :D].set(x)
    linp = jnp.zeros((Dp, Dp), dtype).at[:D, :D].set(linear)
    biasp = jnp.zeros((1, Dp), dtype).at[:, :D].set(bias)

    out_shape = jax.ShapeDtypeStruct((Bp, Dp), dtype)

    if single_tile:
        # One tile: no grid, no per-step pipeline overhead, whole operands in VMEM.
        outp = pl.pallas_call(
            _affine_kernel,
            out_shape=out_shape,
            in_specs=[pl.BlockSpec(memory_space=pltpu.MemorySpace.VMEM)] * 3,
            out_specs=pl.BlockSpec(memory_space=pltpu.MemorySpace.VMEM),
        )(xp, linp, biasp)
    else:
        # Tile only over B; linear + bias are DMA'd once and stay VMEM-resident.
        outp = pl.pallas_call(
            _affine_kernel,
            out_shape=out_shape,
            grid=(Bp // tb,),
            in_specs=[
                pl.BlockSpec((tb, Dp), lambda i: (i, 0)),
                pl.BlockSpec((Dp, Dp), lambda i: (0, 0)),
                pl.BlockSpec((1, Dp), lambda i: (0, 0)),
            ],
            out_specs=pl.BlockSpec((tb, Dp), lambda i: (i, 0)),
            compiler_params=pltpu.CompilerParams(
                dimension_semantics=("parallel",),
            ),
        )(xp, linp, biasp)

    return outp[:B, :D]


def reference(x, noise, linear):
    return (x + noise) @ linear


if __name__ == "__main__":
    key = jax.random.PRNGKey(0)
    k_noise, k_lin, k_x, k_x2 = jax.random.split(key, 4)

    lambd = 0.1
    n_dims = 32
    batch = 8

    # Deterministic "module __init__" parameters (synthetic, not a checkpoint).
    noise = jax.random.normal(k_noise, (n_dims,), dtype=jnp.float32)[None, :] * lambd
    linear = (
        jnp.eye(n_dims, dtype=jnp.float32)
        + jax.random.normal(k_lin, (n_dims, n_dims), dtype=jnp.float32) * lambd
    )

    # --- small path: single tile, no grid ------------------------------------
    x = jax.random.normal(k_x, (batch, n_dims), dtype=jnp.float32)
    out = jax.block_until_ready(distortion_model_affine(x, noise, linear))
    assert out.shape == (batch, n_dims)
    assert jnp.allclose(out, reference(x, noise, linear), atol=1e-5, rtol=1e-5)

    # --- tiled path: grid over B with VMEM-resident linear --------------------
    x_big = jax.random.normal(k_x2, (64, n_dims), dtype=jnp.float32)
    out_big = jax.block_until_ready(
        distortion_model_affine(x_big, noise, linear, block_b=16)
    )
    assert out_big.shape == (64, n_dims)
    assert jnp.allclose(out_big, reference(x_big, noise, linear), atol=1e-5, rtol=1e-5)

    print("KERNEL_OK")
</pallas_src>

<mosaic_0001>
module attributes {stable_mosaic.version = 11 : i64} {
  func.func @_affine_kernel(%arg0: memref<8x128xf32, #tpu.memory_space<vmem>>, %arg1: memref<128x128xf32, #tpu.memory_space<vmem>>, %arg2: memref<1x128xf32, #tpu.memory_space<vmem>>, %arg3: memref<8x128xf32, #tpu.memory_space<vmem>>) attributes {dimension_semantics = [], scalar_prefetch = 0 : i64, scratch_operands = 0 : i64, tpu.core_type = #tpu.core_type<tc>} {
    %c0 = arith.constant 0 : index
    %c0_0 = arith.constant 0 : index
    %0 = vector.load %arg0[%c0, %c0_0] : memref<8x128xf32, #tpu.memory_space<vmem>>, vector<8x128xf32>
    %c0_1 = arith.constant 0 : index
    %c0_2 = arith.constant 0 : index
    %1 = vector.load %arg1[%c0_1, %c0_2] : memref<128x128xf32, #tpu.memory_space<vmem>>, vector<128x128xf32>
    %cst = arith.constant dense<0.000000e+00> : vector<8x128xf32>
    %2 = tpu.matmul %0, %1, %cst {dimension_numbers = #tpu.dot_dimension_numbers<[1], [0], [0], [1], [0, 0, 1, 1], [], []>} : vector<8x128xf32>, vector<128x128xf32>, vector<8x128xf32> -> vector<8x128xf32>
    %c0_3 = arith.constant 0 : index
    %c0_4 = arith.constant 0 : index
    %3 = vector.load %arg2[%c0_3, %c0_4] : memref<1x128xf32, #tpu.memory_space<vmem>>, vector<1x128xf32>
    %4 = vector.broadcast %3 : vector<1x128xf32> to vector<8x128xf32>
    %5 = arith.addf %2, %4 : vector<8x128xf32>
    %c0_5 = arith.constant 0 : index
    %c0_6 = arith.constant 0 : index
    %6 = vector.load %arg3[%c0_5, %c0_6] : memref<8x128xf32, #tpu.memory_space<vmem>>, vector<8x128xf32>
    tpu.vector_store %arg3[%c0_5, %c0_6], %5 {strides = array<i32>} : memref<8x128xf32, #tpu.memory_space<vmem>>, vector<8x128xf32>,
    return
  }
}

</mosaic_0001>

<bundles_post_ra>
// kernel: distortion_model_affine.1
= control target key start
LH: loop header
LB: loop body
LE: loop exit
PB: predicated region body
PF: predicated region fallthrough
CT: control target
= control target key end

     0   :  { %v229_v3 = vmov 0.0|0.0   ;;  %vm230_vm0 = vmmov 0   ;;  %v231_v6 = vmov 0.0   ;;  %s319_s0 = inlined_call_operand.vmem [shape: f32[8,128], index: 0, kind: input, shape index: {}]   ;;  %s320_s1 = inlined_call_operand.vmem [shape: f32[128,128], index: 1, kind: input, shape index: {}]   ;;  %s321_s2 = inlined_call_operand.vmem [shape: f32[1,128], index: 2, kind: input, shape index: {}]   ;;  %s322_s3 = inlined_call_operand.hbm [shape: f32[8,128], index: 3, kind: output, shape index: {}]  }
   0x1   :  { %v16_v0 = vld [vmem:[%s320_s1] sm:$0xff]  ;;  %v17_v1 = vld [vmem:[%s320_s1 + $0x8] sm:$0xff]  ;;  %v18_v2 = vld [vmem:[%s320_s1 + $0x10] sm:$0xff]  ;;  %177 = vmatprep.subr.bf16.mxu0 %v229_v3  ;;  %174 = vmatprep.mubr.msk.f32.mxu0 %vm230_vm0, %v231_v6 }
   0x2   :  { %v178_v4 = vpack.c.bf16 %v17_v1, %v16_v0  ;;  %v19_v5 = vld [vmem:[%s320_s1 + $0x18] sm:$0xff]  ;;  %v20_v8 = vld [vmem:[%s320_s1 + $0x20] sm:$0xff]  ;;  %v21_v9 = vld [vmem:[%s320_s1 + $0x28] sm:$0xff] }
   0x3   :  { %v181_v7 = vpack.c.bf16 %v19_v5, %v18_v2 }
   0x4   :  { %179 = vmatpush3.bf16.msra.mxu0 %v178_v4 }
   0x5   :  { %180 = vmatprep.subr.bf16.mxu0 %v229_v3 }
   0x6   :  { %8 = vsyncpa [#allocation3], 0  ;;  %v184_v10 = vpack.c.bf16 %v21_v9, %v20_v8  ;;  %v22_v11 = vld [vmem:[%s320_s1 + $0x30] sm:$0xff]  ;;  %v23_v12 = vld [vmem:[%s320_s1 + $0x38] sm:$0xff]  ;;  %s232_s21 = smov [#allocation2]  }
   0x7   :  { %v187_v13 = vpack.c.bf16 %v23_v12, %v22_v11  ;;  %v24_v14 = vld [vmem:[%s320_s1 + $0x40] sm:$0xff]  ;;  %v25_v15 = vld [vmem:[%s320_s1 + $0x48] sm:$0xff]  ;;  %v26_v17 = vld [vmem:[%s320_s1 + $0x50] sm:$0xff]  ;;  %s116_s22 = sshll.u32 %s232_s21, 4  ;;  %s117_s22 = int_to_ptr.vmem [resolvable:$true] %s116_s22 }
   0x8   :  { %182 = vmatpush3.bf16.msra.mxu0 %v181_v7  ;;  %v190_v16 = vpack.c.bf16 %v25_v15, %v24_v14  ;;  %v27_v18 = vld [vmem:[%s320_s1 + $0x58] sm:$0xff]  ;;  %v28_v20 = vld [vmem:[%s320_s1 + $0x60] sm:$0xff]  ;;  %v29_v21 = vld [vmem:[%s320_s1 + $0x68] sm:$0xff]  ;;  %p210_p1 = scmp.lt.s32.totalorder %s117_s22, %s117_s22 }
   0x9   :  { %183 = vmatprep.subr.bf16.mxu0 %v229_v3  ;;  %v193_v19 = vpack.c.bf16 %v27_v18, %v26_v17  ;;  %v196_v22 = vpack.c.bf16 %v29_v21, %v28_v20  ;;  %v30_v23 = vld [vmem:[%s320_s1 + $0x70] sm:$0xff]  ;;  %v31_v24 = vld [vmem:[%s320_s1 + $0x78] sm:$0xff]  ;;  %v15_v26 = vld [vmem:[%s319_s0] sm:$0xff]  ;;  %s205_s1 = scalar_lea.vmem %s117_s22, 128 }
   0xa   :  { %v199_v25 = vpack.c.bf16 %v31_v24, %v30_v23  ;;  %v124_v27 = vld [vmem:[%s321_s2] ss:$0 sm:$0xff]  ;;  %p206_p0 = scmp.ne.s32.totalorder %s117_s22, %s205_s1  ;;  %p211_p2 = scmp.lt.s32.totalorder %s205_s1, %s205_s1 }
   0xc   :  { %185 = vmatpush3.bf16.msra.mxu0 %v184_v10  ;;  %p212_p3 = por %p211_p2, %p210_p1 }
   0xd   :  { %186 = vmatprep.subr.bf16.mxu0 %v229_v3 }
   0xe   :  { %p213_p4 = pnand %p212_p3, %p206_p0 }
  0x10   :  { %188 = vmatpush3.bf16.msra.mxu0 %v187_v13 }
  0x11   :  { %189 = vmatprep.subr.bf16.mxu0 %v229_v3 }
  0x14   :  { %191 = vmatpush3.bf16.msra.mxu0 %v190_v16 }
  0x15   :  { %192 = vmatprep.subr.bf16.mxu0 %v229_v3 }
  0x18   :  { %194 = vmatpush3.bf16.msra.mxu0 %v193_v19 }
  0x19   :  { %195 = vmatprep.subr.bf16.mxu0 %v229_v3 }
  0x1c   :  { %197 = vmatpush3.bf16.msra.mxu0 %v196_v22 }
  0x1d   :  { %198 = vmatprep.subr.bf16.mxu0 %v229_v3 }
  0x20   :  { %200 = vmatpush3.bf16.msra.mxu0 %v199_v25 }
  0x23   :  { %175 = vmatmul.mubr.f32.vlgmr.msra.gmra.mrb[0].mxu0 %v15_v26 }
  0xf6   :  { %v105_v28 = vpop.f32.mrb[0].mxu0 }
  0xf7   :  { %v106_v29 = vadd.f32 %v124_v27, %v105_v28  ;;  %v176_v30 = vpop.f32.mrb[1].mxu0 }
  0xf9   :  { %109 = vst [vmem:[#allocation2] sm:$0xff] %v106_v29 }
  0xfa   :  { %216 = shalt.err (!%p213_p4)
}
  0xfb   :  { %s217_s24 = scalar_lea.hbm %s322_s3, 128 }
  0xfc   :  { %p218_p5 = scmp.ne.s32.totalorder %s322_s3, %s217_s24  ;;  %p221_p6 = scmp.lt.u32.totalorder %s217_s24, %s322_s3 }
  0xfe   :  { %p223_p7 = pnand %p221_p6, %p218_p5 }
 0x100   :  { %226 = shalt.err (!%p223_p7)
}
 0x101   :  { %119 = dma.vmem_to_hbm [thread:$0]  %s117_s22, 128, %s322_s3, [#allocation3]  }
 0x102   :  { %227 = dma.done.wait [#allocation3], 128  }
 0x103   :  { %228 = vsyncadd [#allocation3], 4294967168 }
 0x104   :  { %123 = vsyncpa [#allocation3], 1 }

</bundles_post_ra>
